<compile_context>
chip_gen: v7x
topology: tpu7x:2x2x1
jax: 0.10.0
libtpu: 0.0.40
codegen_flags: <defaults>
</compile_context>

<pallas_src>
import functools
import math

import jax
import jax.numpy as jnp
from jax import lax
from jax.experimental import pallas as pl
from jax.experimental.pallas import tpu as pltpu

_LANE = 128
_INV_SQRT2 = 1.0 / math.sqrt(2.0)


def _round_up(x, m):
    return ((x + m - 1) // m) * m


def _sublane(dtype):
    return {4: 8, 2: 16, 1: 32}.get(jnp.dtype(dtype).itemsize, 8)


def _gelu_exact(g):
    # Exact (erf) GELU in f32 — matches torch.nn.functional.gelu default.
    return 0.5 * g * (1.0 + lax.erf(g * _INV_SQRT2))


# ---------------------------------------------------------------------------
# Kernels
# ---------------------------------------------------------------------------
def _ffn_kernel_scratch(x_ref, w1_ref, b1_ref, w2_ref, b2_ref, o_ref,
                        acc_ref, *, th):
    """Generic-output-dtype variant: accumulate in an f32 VMEM scratch."""
    j = pl.program_id(1)

    @pl.when(j == 0)
    def _init():
        acc_ref[...] = jnp.zeros_like(acc_ref)

    x = x_ref[...]
    # Fused first linear: one (tm, dim) @ (dim, 2*th) matmul per hidden tile.
    h = jnp.dot(x, w1_ref[...], preferred_element_type=jnp.float32)
    h = h + b1_ref[...]                       # b1 is f32
    a = h[:, :th]                             # GEGLU value half (tile-aligned slice)
    g = h[:, th:]                             # GEGLU gate half
    act = a * _gelu_exact(g)

    acc_ref[...] += jnp.dot(act.astype(w2_ref.dtype), w2_ref[...],
                            preferred_element_type=jnp.float32)

    @pl.when(j == pl.num_programs(1) - 1)
    def _finalize():
        o_ref[...] = (acc_ref[...] + b2_ref[...]).astype(o_ref.dtype)


def _ffn_kernel_f32out(x_ref, w1_ref, b1_ref, w2_ref, b2_ref, o_ref, *, th):
    """f32-output variant: accumulate directly into the resident output block."""
    j = pl.program_id(1)

    @pl.when(j == 0)
    def _init():
        o_ref[...] = jnp.zeros_like(o_ref)

    x = x_ref[...]
    h = jnp.dot(x, w1_ref[...], preferred_element_type=jnp.float32)
    h = h + b1_ref[...]
    a = h[:, :th]
    g = h[:, th:]
    act = a * _gelu_exact(g)

    o_ref[...] += jnp.dot(act.astype(w2_ref.dtype), w2_ref[...],
                          preferred_element_type=jnp.float32)

    @pl.when(j == pl.num_programs(1) - 1)
    def _finalize():
        o_ref[...] += b2_ref[...]


# ---------------------------------------------------------------------------
# One-time parameter preparation (split / pad / pack / cast) — NOT per call.
# ---------------------------------------------------------------------------
def prepare_feed_forward(w1, b1, w2, b2, *, th=256, compute_dtype=None):
    """Pre-split, pre-pad, per-tile-pack and pre-cast the FeedForward weights.

    w1: [dim, 2*hidden]  b1: [2*hidden]   (Linear stored as [in, out])
    w2: [hidden, dim]    b2: [dim]
    compute_dtype: dtype fed to the MXU (use jnp.bfloat16 for real workloads).
    """
    dim, two_hidden = w1.shape
    hidden = two_hidden // 2
    if compute_dtype is None:
        compute_dtype = w1.dtype
    compute_dtype = jnp.dtype(compute_dtype)

    # Lane-dense output; pad dim to 256 for the 256-wide v6e/v7x MXU when the
    # dim is already larger than one lane tile (bounds waste for tiny dims).
    dim_align = 256 if dim > _LANE else _LANE
    dim_p = _round_up(dim, dim_align)

    th_eff = _round_up(min(th, _round_up(hidden, _LANE)), _LANE)
    hidden_p = _round_up(hidden, th_eff)
    n_j = hidden_p // th_eff

    # GEGLU value ("a") / gate ("g") halves, zero-padded (exact: gelu(0)=0).
    w1a = jnp.pad(w1[:, :hidden], ((0, dim_p - dim), (0, hidden_p - hidden)))
    w1g = jnp.pad(w1[:, hidden:], ((0, dim_p - dim), (0, hidden_p - hidden)))
    # Pack per hidden tile j: columns [value_tile_j | gate_tile_j] so the
    # kernel streams ONE weight tile of shape (dim_p, 2*th) per reduction step.
    w1_packed = jnp.concatenate(
        [w1a.reshape(dim_p, n_j, th_eff), w1g.reshape(dim_p, n_j, th_eff)],
        axis=-1).reshape(dim_p, n_j * 2 * th_eff).astype(compute_dtype)

    b1a = jnp.pad(b1[:hidden], (0, hidden_p - hidden)).reshape(n_j, th_eff)
    b1g = jnp.pad(b1[hidden:], (0, hidden_p - hidden)).reshape(n_j, th_eff)
    b1_packed = jnp.concatenate([b1a, b1g], axis=-1).reshape(
        1, n_j * 2 * th_eff).astype(jnp.float32)          # biases stay f32

    w2_p = jnp.pad(w2, ((0, hidden_p - hidden), (0, dim_p - dim))
                   ).astype(compute_dtype)
    b2_p = jnp.pad(b2, (0, dim_p - dim)).reshape(1, dim_p).astype(jnp.float32)

    return dict(w1=w1_packed, b1=b1_packed, w2=w2_p, b2=b2_p,
                dim=dim, dim_p=dim_p, hidden=hidden, hidden_p=hidden_p,
                th=th_eff, n_j=n_j, compute_dtype=compute_dtype)


# ---------------------------------------------------------------------------
# Forward call
# ---------------------------------------------------------------------------
def _vmem_limit_bytes(tm_eff, dim_p, th, compute_dtype, out_dtype, use_scratch):
    cd = jnp.dtype(compute_dtype).itemsize
    od = jnp.dtype(out_dtype).itemsize
    per_buf = (tm_eff * dim_p * cd           # x tile
               + dim_p * 2 * th * cd         # packed W1 tile
               + 2 * th * 4                  # b1 tile (f32)
               + th * dim_p * cd             # W2 tile
               + dim_p * 4                   # b2 (f32)
               + tm_eff * dim_p * od)        # output tile
    total = 2 * per_buf                      # double-buffered pipeline
    if use_scratch:
        total += tm_eff * dim_p * 4          # f32 accumulator
    total += 8 * 1024 * 1024                 # compiler scratch / semaphore headroom
    return int(max(min(total, 100 * 1024 * 1024), 16 * 1024 * 1024))


def feed_forward(x, params, *, tm=512, weight_buffers=None):
    """FeedForward forward pass: Linear(dim, 2*hidden) -> GEGLU -> Linear(hidden, dim).

    x: [..., dim]; params: output of prepare_feed_forward().
    """
    dim, dim_p = params["dim"], params["dim_p"]
    th, n_j = params["th"], params["n_j"]
    compute_dtype = params["compute_dtype"]

    orig_shape = x.shape
    out_dtype = x.dtype
    x2 = x.reshape(-1, dim)
    tokens = x2.shape[0]

    # Token tile rounded to the compute-dtype-native sublane count.
    sub = _sublane(compute_dtype)
    tm_eff = _round_up(min(tm, _round_up(tokens, sub)), sub)
    tokens_p = _round_up(tokens, tm_eff)

    x_p = jnp.pad(x2, ((0, tokens_p - tokens), (0, dim_p - dim))
                  ).astype(compute_dtype)

    grid = (tokens_p // tm_eff, n_j)

    use_direct = jnp.dtype(out_dtype) == jnp.dtype(jnp.float32)
    if use_direct:
        kernel = functools.partial(_ffn_kernel_f32out, th=th)
        scratch_shapes = []
    else:
        kernel = functools.partial(_ffn_kernel_scratch, th=th)
        scratch_shapes = [pltpu.VMEM((tm_eff, dim_p), jnp.float32)]

    def _w_spec(shape, index_map):
        if weight_buffers is None:
            return pl.BlockSpec(shape, index_map)
        # Deeper weight pipelining (useful on v5e's lower HBM bandwidth).
        return pl.BlockSpec(shape, index_map,
                            pipeline_mode=pl.Buffered(weight_buffers))

    vmem_limit = _vmem_limit_bytes(tm_eff, dim_p, th, compute_dtype, out_dtype,
                                   use_scratch=not use_direct)

    out = pl.pallas_call(
        kernel,
        out_shape=jax.ShapeDtypeStruct((tokens_p, dim_p), out_dtype),
        grid_spec=pltpu.PrefetchScalarGridSpec(
            num_scalar_prefetch=0,
            grid=grid,
            in_specs=[
                pl.BlockSpec((tm_eff, dim_p), lambda i, j: (i, 0)),   # x tile
                _w_spec((dim_p, 2 * th), lambda i, j: (0, j)),        # packed W1 tile
                pl.BlockSpec((1, 2 * th), lambda i, j: (0, j)),       # packed b1 tile
                _w_spec((th, dim_p), lambda i, j: (j, 0)),            # W2 row tile
                pl.BlockSpec((1, dim_p), lambda i, j: (0, 0)),        # b2
            ],
            out_specs=pl.BlockSpec((tm_eff, dim_p), lambda i, j: (i, 0)),
            scratch_shapes=scratch_shapes,
        ),
        compiler_params=pltpu.CompilerParams(
            dimension_semantics=("parallel", "arbitrary"),
            vmem_limit_bytes=vmem_limit,
        ),
    )(x_p, params["w1"], params["b1"], params["w2"], params["b2"])

    out = out[:tokens, :dim]
    return out.reshape(orig_shape[:-1] + (dim,))


# ---------------------------------------------------------------------------
# Test harness
# ---------------------------------------------------------------------------
def _init_params(key, dim, mult=4, dtype=jnp.float32):
    """Deterministic synthetic params. Weights stored as [in, out]."""
    hidden = dim * mult
    k1, k2, k3, k4 = jax.random.split(key, 4)
    lim1 = 1.0 / math.sqrt(dim)
    lim2 = 1.0 / math.sqrt(hidden)
    w1 = jax.random.uniform(k1, (dim, hidden * 2), dtype, -lim1, lim1)
    b1 = jax.random.uniform(k2, (hidden * 2,), dtype, -lim1, lim1)
    w2 = jax.random.uniform(k3, (hidden, dim), dtype, -lim2, lim2)
    b2 = jax.random.uniform(k4, (dim,), dtype, -lim2, lim2)
    return w1, b1, w2, b2


def _reference(x, w1, b1, w2, b2):
    """Pure-JAX reference matching the PyTorch module semantics."""
    h = x @ w1 + b1
    a, g = jnp.split(h, 2, axis=-1)
    act = a * jax.nn.gelu(g, approximate=False)
    return act @ w2 + b2


if __name__ == "__main__":
    B, S, dim, mult = 2, 8, 64, 4          # hidden = 256
    key = jax.random.PRNGKey(0)
    kx, kp = jax.random.split(key)
    x = jax.random.normal(kx, (B, S, dim), jnp.float32)
    w1, b1, w2, b2 = _init_params(kp, dim, mult)

    ref = _reference(x, w1, b1, w2, b2)

    # f32 path (direct output accumulation) with a multi-tile hidden reduction.
    params_f32 = prepare_feed_forward(w1, b1, w2, b2, th=128)
    out_f32 = jax.block_until_ready(feed_forward(x, params_f32))
    assert out_f32.shape == (B, S, dim)
    assert jnp.allclose(out_f32, ref, atol=2e-5, rtol=2e-5), "f32 mismatch vs reference"

    # bf16 compute path (scratch accumulator kernel), single hidden tile.
    params_bf16 = prepare_feed_forward(w1, b1, w2, b2, th=256,
                                       compute_dtype=jnp.bfloat16)
    out_bf16 = jax.block_until_ready(
        feed_forward(x.astype(jnp.bfloat16), params_bf16))
    assert out_bf16.shape == (B, S, dim)
    assert jnp.allclose(out_bf16.astype(jnp.float32), ref,
                        atol=6e-2, rtol=6e-2), "bf16 mismatch vs reference"

    print("KERNEL_OK")
</pallas_src>

<mosaic_0001>
module attributes {stable_mosaic.version = 11 : i64} {
  func.func @_ffn_kernel_f32out(%arg0: i32, %arg1: i32, %arg2: memref<16x128xf32, #tpu.memory_space<vmem>>, %arg3: memref<128x256xf32, #tpu.memory_space<vmem>>, %arg4: memref<1x256xf32, #tpu.memory_space<vmem>>, %arg5: memref<128x128xf32, #tpu.memory_space<vmem>>, %arg6: memref<1x128xf32, #tpu.memory_space<vmem>>, %arg7: memref<16x128xf32, #tpu.memory_space<vmem>>) attributes {dimension_semantics = [#tpu.dimension_semantics<parallel>, #tpu.dimension_semantics<arbitrary>], iteration_bounds = array<i64: 1, 2>, scalar_prefetch = 0 : i64, scratch_operands = 0 : i64, tpu.core_type = #tpu.core_type<tc>, window_params = [{transform_indices = @transform_0, window_bounds = array<i64: 16, 128>}, {transform_indices = @transform_1, window_bounds = array<i64: 128, 256>}, {transform_indices = @transform_2, window_bounds = array<i64: 1, 256>}, {transform_indices = @transform_3, window_bounds = array<i64: 128, 128>}, {pipeline_mode = #tpu.pipeline_mode<synchronous>, transform_indices = @transform_4, window_bounds = array<i64: 1, 128>}, {transform_indices = @transform_5, window_bounds = array<i64: 16, 128>}]} {
    %c0_i32 = arith.constant 0 : i32
    %0 = arith.cmpi eq, %arg1, %c0_i32 : i32
    %1 = arith.extui %0 : i1 to i32
    %c0_i32_0 = arith.constant 0 : i32
    %2 = arith.cmpi ne, %1, %c0_i32_0 : i32
    scf.if %2 {
      %cst_17 = arith.constant 0.000000e+00 : f32
      %28 = vector.broadcast %cst_17 : f32 to vector<16x128xf32>
      %c0_18 = arith.constant 0 : index
      %c0_19 = arith.constant 0 : index
      %29 = vector.load %arg7[%c0_18, %c0_19] : memref<16x128xf32, #tpu.memory_space<vmem>>, vector<16x128xf32>
      tpu.vector_store %arg7[%c0_18, %c0_19], %28 {strides = array<i32>} : memref<16x128xf32, #tpu.memory_space<vmem>>, vector<16x128xf32>,
    } else {
    }
    %c0 = arith.constant 0 : index
    %c0_1 = arith.constant 0 : index
    %3 = vector.load %arg2[%c0, %c0_1] : memref<16x128xf32, #tpu.memory_space<vmem>>, vector<16x128xf32>
    %c0_2 = arith.constant 0 : index
    %c0_3 = arith.constant 0 : index
    %4 = vector.load %arg3[%c0_2, %c0_3] : memref<128x256xf32, #tpu.memory_space<vmem>>, vector<128x256xf32>
    %cst = arith.constant dense<0.000000e+00> : vector<16x256xf32>
    %5 = tpu.matmul %3, %4, %cst {dimension_numbers = #tpu.dot_dimension_numbers<[1], [0], [0], [1], [0, 0, 1, 1], [], []>} : vector<16x128xf32>, vector<128x256xf32>, vector<16x256xf32> -> vector<16x256xf32>
    %c0_4 = arith.constant 0 : index
    %c0_5 = arith.constant 0 : index
    %6 = vector.load %arg4[%c0_4, %c0_5] : memref<1x256xf32, #tpu.memory_space<vmem>>, vector<1x256xf32>
    %7 = vector.broadcast %6 : vector<1x256xf32> to vector<16x256xf32>
    %8 = arith.addf %5, %7 : vector<16x256xf32>
    %9 = vector.extract_strided_slice %8 {offsets = [0, 0], sizes = [16, 128], strides = [1, 1]} : vector<16x256xf32> to vector<16x128xf32>
    %10 = vector.extract_strided_slice %8 {offsets = [0, 128], sizes = [16, 128], strides = [1, 1]} : vector<16x256xf32> to vector<16x128xf32>
    %cst_6 = arith.constant 5.000000e-01 : f32
    %11 = vector.broadcast %cst_6 : f32 to vector<16x128xf32>
    %12 = arith.mulf %11, %10 : vector<16x128xf32>
    %cst_7 = arith.constant 0.707106769 : f32
    %13 = vector.broadcast %cst_7 : f32 to vector<16x128xf32>
    %14 = arith.mulf %10, %13 : vector<16x128xf32>
    %15 = math.erf %14 : vector<16x128xf32>
    %cst_8 = arith.constant 1.000000e+00 : f32
    %16 = vector.broadcast %cst_8 : f32 to vector<16x128xf32>
    %17 = arith.addf %16, %15 : vector<16x128xf32>
    %18 = arith.mulf %12, %17 : vector<16x128xf32>
    %19 = arith.mulf %9, %18 : vector<16x128xf32>
    %c0_9 = arith.constant 0 : index
    %c0_10 = arith.constant 0 : index
    %20 = vector.load %arg7[%c0_9, %c0_10] : memref<16x128xf32, #tpu.memory_space<vmem>>, vector<16x128xf32>
    %c0_11 = arith.constant 0 : index
    %c0_12 = arith.constant 0 : index
    %21 = vector.load %arg5[%c0_11, %c0_12] : memref<128x128xf32, #tpu.memory_space<vmem>>, vector<128x128xf32>
    %cst_13 = arith.constant dense<0.000000e+00> : vector<16x128xf32>
    %22 = tpu.matmul %19, %21, %cst_13 {dimension_numbers = #tpu.dot_dimension_numbers<[1], [0], [0], [1], [0, 0, 1, 1], [], []>} : vector<16x128xf32>, vector<128x128xf32>, vector<16x128xf32> -> vector<16x128xf32>
    %23 = arith.addf %20, %22 : vector<16x128xf32>
    %c0_14 = arith.constant 0 : index
    %c0_15 = arith.constant 0 : index
    %24 = vector.load %arg7[%c0_14, %c0_15] : memref<16x128xf32, #tpu.memory_space<vmem>>, vector<16x128xf32>
    tpu.vector_store %arg7[%c0_14, %c0_15], %23 {strides = array<i32>} : memref<16x128xf32, #tpu.memory_space<vmem>>, vector<16x128xf32>,
    %c1_i32 = arith.constant 1 : i32
    %25 = arith.cmpi eq, %arg1, %c1_i32 : i32
    %26 = arith.extui %25 : i1 to i32
    %c0_i32_16 = arith.constant 0 : i32
    %27 = arith.cmpi ne, %26, %c0_i32_16 : i32
    scf.if %27 {
      %c0_17 = arith.constant 0 : index
      %c0_18 = arith.constant 0 : index
      %28 = vector.load %arg7[%c0_17, %c0_18] : memref<16x128xf32, #tpu.memory_space<vmem>>, vector<16x128xf32>
      %c0_19 = arith.constant 0 : index
      %c0_20 = arith.constant 0 : index
      %29 = vector.load %arg6[%c0_19, %c0_20] : memref<1x128xf32, #tpu.memory_space<vmem>>, vector<1x128xf32>
      %30 = vector.broadcast %29 : vector<1x128xf32> to vector<16x128xf32>
      %31 = arith.addf %28, %30 : vector<16x128xf32>
      %c0_21 = arith.constant 0 : index
      %c0_22 = arith.constant 0 : index
      %32 = vector.load %arg7[%c0_21, %c0_22] : memref<16x128xf32, #tpu.memory_space<vmem>>, vector<16x128xf32>
      tpu.vector_store %arg7[%c0_21, %c0_22], %31 {strides = array<i32>} : memref<16x128xf32, #tpu.memory_space<vmem>>, vector<16x128xf32>,
    } else {
    }
    return
  }
  func.func @transform_0(%arg0: i32, %arg1: i32) -> (i32, i32) {
    %c0_i32 = arith.constant 0 : i32
    %c0_i32_0 = arith.constant 0 : i32
    return %arg0, %c0_i32 : i32, i32
  }
  func.func @transform_1(%arg0: i32, %arg1: i32) -> (i32, i32) {
    %c0_i32 = arith.constant 0 : i32
    %c0_i32_0 = arith.constant 0 : i32
    return %c0_i32, %arg1 : i32, i32
  }
  func.func @transform_2(%arg0: i32, %arg1: i32) -> (i32, i32) {
    %c0_i32 = arith.constant 0 : i32
    %c0_i32_0 = arith.constant 0 : i32
    return %c0_i32, %arg1 : i32, i32
  }
  func.func @transform_3(%arg0: i32, %arg1: i32) -> (i32, i32) {
    %c0_i32 = arith.constant 0 : i32
    %c0_i32_0 = arith.constant 0 : i32
    return %arg1, %c0_i32 : i32, i32
  }
  func.func @transform_4(%arg0: i32, %arg1: i32) -> (i32, i32) {
    %c0_i32 = arith.constant 0 : i32
    %c0_i32_0 = arith.constant 0 : i32
    %c0_i32_1 = arith.constant 0 : i32
    return %c0_i32, %c0_i32_0 : i32, i32
  }
  func.func @transform_5(%arg0: i32, %arg1: i32) -> (i32, i32) {
    %c0_i32 = arith.constant 0 : i32
    %c0_i32_0 = arith.constant 0 : i32
    return %arg0, %c0_i32 : i32, i32
  }
}

</mosaic_0001>

<bundles_post_ra>
// kernel: tpu_custom_call.1
= control target key start
LH: loop header
LB: loop body
LE: loop exit
PB: predicated region body
PF: predicated region fallthrough
CT: control target
= control target key end

     0   :  { %s1451_s0 = inlined_call_operand.hbm [shape: f32[16,128], index: 0, kind: input, shape index: {}]   ;;  %s1452_s1 = inlined_call_operand.hbm [shape: f32[128,512], index: 1, kind: input, shape index: {}]   ;;  %s1453_s2 = inlined_call_operand.vmem [shape: f32[1,512], index: 2, kind: input, shape index: {}]   ;;  %s1454_s3 = inlined_call_operand.hbm [shape: f32[256,128], index: 3, kind: input, shape index: {}]   ;;  %s1455_s4 = inlined_call_operand.vmem [shape: f32[1,128], index: 4, kind: input, shape index: {}]   ;;  %s1456_s5 = inlined_call_operand.hbm [shape: f32[16,128], index: 5, kind: output, shape index: {}]  }
   0x1   :  { %1463 = sst [smem:[#allocation12_spill]] %s1452_s1 }
   0x2   :  { %10 = vsyncpa [#allocation3], 0 }
   0x3   :  { %11 = vsyncpa [#allocation6], 0 }
   0x4   :  { %13 = vsyncpa [#allocation6 + $0x1], 0 }
   0x5   :  { %14 = vsyncpa [#allocation4], 0  ;;  %s1151_s18 = smov 0   ;;  %s1153_s19 = smov 0  }
   0x6   :  { %s1155_s20 = smov 0   ;;  %s1157_s21 = smov 0  }
   0x7   :  { %s1159_s22 = smov 0   ;;  %s1161_s23 = smov 0  }
   0x8 LB: > { %s29_s24 = sadd.s32 1, %s1102_s22  ;;  %s65_s25 = sadd.s32 1, %s1094_s20  ;;  %s1106_s23 = sphi %s1161_s23, %s20_s23   ;;  %s1102_s22 = sphi %s1159_s22, %s1480_s22   ;;  %s1098_s21 = sphi %s1157_s21, %s1479_s21   ;;  %s1094_s20 = sphi %s1155_s20, %s1478_s20   ;;  %s1090_s19 = sphi %s1153_s19, %s1477_s19   ;;  %s1086_s18 = sphi %s1151_s18, %s1476_s18  }
   0x9   : > { %p30_p0 = scmp.ge.s32.totalorder %s29_s24, 2  ;;  %p72_p1 = scmp.ne.s32.totalorder %s1094_s20, %s1090_s19 }
   0xa   : > { %p73_p2 = scmp.eq.s32.totalorder %s1106_s23, 0  ;;  %p867_p4 = scmp.lt.s32.totalorder %s1106_s23, 2 }
   0xb   : > { %s1482_s24 = smov (%p30_p0, %s29_s24), 0  ;;  %s220_s27 = sand.u32 1, %s1106_s23  }
   0xc   : > { %p74_p3 = por %p73_p2, %p72_p1  ;;  %s62_s26 = ssub.s32 %s1102_s22, %s1482_s24 }
   0xd   : > { %p63_p5 = scmp.eq.s32.totalorder %s62_s26, 0  ;;  %s222_s28 = sand.u32 1, %s1094_s20  }
   0xe   : > { %s724_s29 = sshll.u32 %s1102_s22, 8  ;;  %s706_s6 = sshll.u32 %s222_s28, 8 }
   0xf   : > { %s1195_s30 = scalar_select %p63_p5, %s1094_s20, %s65_s25  }
  0x10   : > { %s1464_s1 = sld [smem:[#allocation12_spill]]  ;;  %p1204_p6 = pnand %p867_p4, %p74_p3 }
  0x11   : > { %s224_s11 = scalar_lea.vmem [#allocation5], %s706_s6  ;;  %s1210_s13 = scalar_lea.sflag [#allocation6], %s220_s27 }
  0x12   : > { %s1465_s10 = scalar_select %p1204_p6, 1, 0 }
  0x13   : > { %s231_s12 = sshll.u32 %s224_s11, 4  ;;  %p1458_p8 = pneg %p1204_p6  ;;  %s1208_s12 = int_to_ptr.vmem [resolvable:$true] %s231_s12 }
  0x16   : > { %s1202_s9 = scalar_lea.hbm %s1464_s1, %s724_s29  ;;  %s939_s17 = scalar_lea.hbm %s1464_s1, 8192 }
  0x17   : > { %s934_s14 = scalar_lea.hbm %s1202_s9, 4096  ;;  %p940_p11 = scmp.lt.u32.totalorder %s1202_s9, %s1464_s1 }
  0x18   : > { %p935_p7 = scmp.ne.s32.totalorder %s1202_s9, %s934_s14  ;;  %p941_p12 = scmp.lt.u32.totalorder %s939_s17, %s934_s14 }
  0x19   : > { %p943_p0 = scmp.lt.u32.totalorder %s934_s14, %s1202_s9 }
  0x1a   : > { %p937_p9 = pnand %p1458_p8, %p935_p7  ;;  %p942_p13 = por %p941_p12, %p940_p11 }
  0x1c   : > { %p938_p10 = pneg %p937_p9  ;;  %p944_p1 = por %p943_p0, %p942_p13 }
  0x1e   : > { %p945_p2 = pnand %p944_p1, %p938_p10 }
  0x20   : > { %948 = shalt.err (!%p945_p2)
}
  0x21   : > { %s949_s27 = scalar_lea.vmem %s1208_s12, 4096  ;;  %s1108_s29 = smov [#allocation5]  }
  0x22   : > { %p950_p3 = scmp.ne.s32.totalorder %s1208_s12, %s949_s27  ;;  %s954_s6 = sshll.u32 %s1108_s29, 4  ;;  %s955_s6 = int_to_ptr.vmem [resolvable:$false] %s954_s6 }
  0x23   : > { %s956_s7 = scalar_lea.vmem %s955_s6, 8192  ;;  %p957_p7 = scmp.lt.s32.totalorder %s1208_s12, %s955_s6 }
  0x24   : > { %p952_p4 = pnand %p950_p3, %p1458_p8  ;;  %p958_p9 = scmp.lt.s32.totalorder %s956_s7, %s949_s27 }
  0x26   : > { %p953_p5 = pneg %p952_p4  ;;  %p959_p11 = por %p958_p9, %p957_p7 }
  0x28   : > { %p960_p12 = pnand %p959_p11, %p953_p5 }
  0x2a   : > { %963 = shalt.err (!%p960_p12)
}
  0x2b   : > { %s1109_s8 = smov 512   ;;  %s1110_s11 = smov 256  }
  0x2c   : > { %s1111_s14 = smov 16   ;;  %s1239_s15 = sadd.s32 4294967295, %s1106_s23  }
  0x2d   : > { %862 = dma.hbm_to_vmem [thread:$0]  (!%p1204_p6), %s1202_s9, 4096, %s1208_s12, %s1210_s13, %s1109_s8, %s1110_s11, %s1111_s14  }
  0x2e   : > { %p78_p10 = scmp.ne.s32.totalorder %s1090_s19, %s1086_s18  ;;  %p1457_p13 = scmp.eq.s32.totalorder %s1239_s15, 0 }
  0x2f   : > { %p703_p0 = scmp.ge.s32.totalorder %s1106_s23, 1  ;;  %p188_p1 = scmp.lt.s32.totalorder %s1106_s23, 3 }
  0x30   : > { %p1248_p2 = por %p1457_p13, %p78_p10  ;;  %s1112_s9 = smov [#allocation2]  }
  0x31   : > { %p1252_p3 = pnand %p703_p0, %p188_p1  ;;  %s203_s12 = sshll.u32 %s1112_s9, 4  ;;  %s1256_s12 = int_to_ptr.vmem [resolvable:$true] %s203_s12 }
  0x32   : > { %s1466_s16 = scalar_select %p1248_p2, 1, 0 }
  0x33   : > { %s1467_s17 = scalar_select %p1252_p3, 1, 0 }
  0x34   : > { %p855_p4 = pneg %p1252_p3  ;;  %s709_s18 = sshll.u32 %s222_s28, 7 }
  0x35   : > { %s725_s25 = sshll.u32 %s1102_s22, 11  ;;  %s253_s7 = scalar_lea.vmem [#allocation7], %s709_s18 }
  0x36   : > { %p1265_p5 = pnand %p855_p4, %p1457_p13  ;;  %s1272_s6 = scalar_lea.hbm %s1454_s3, %s725_s25 }
  0x37   : > { %s260_s8 = sshll.u32 %s253_s7, 4  ;;  %s964_s28 = scalar_lea.hbm %s1451_s0, 256  ;;  %s1274_s8 = int_to_ptr.vmem [resolvable:$true] %s260_s8 }
  0x38   : > { %p965_p7 = scmp.ne.s32.totalorder %s1451_s0, %s964_s28  ;;  %p966_p9 = pneg %p1265_p5 }
  0x39   : > { %p971_p10 = scmp.lt.u32.totalorder %s964_s28, %s1451_s0 }
  0x3a   : > { %p967_p11 = pnand %p966_p9, %p965_p7 }
  0x3c   : > { %p968_p12 = pneg %p967_p11 }
  0x3e   : > { %p973_p0 = pnand %p971_p10, %p968_p12 }
  0x40   : > { %976 = shalt.err (!%p973_p0)
}
  0x41   : > { %s977_s18 = scalar_lea.vmem %s1256_s12, 256  ;;  %p985_p8 = scmp.lt.s32.totalorder %s1256_s12, %s1256_s12 }
  0x42   : > { %p978_p1 = scmp.ne.s32.totalorder %s1256_s12, %s977_s18  ;;  %p986_p2 = scmp.lt.s32.totalorder %s977_s18, %s977_s18 }
  0x44   : > { %p980_p4 = pnand %p978_p1, %p966_p9  ;;  %p987_p3 = por %p986_p2, %p985_p8 }
  0x46   : > { %p981_p13 = pneg %p980_p4 }
  0x48   : > { %p988_p6 = pnand %p987_p3, %p981_p13 }
  0x4a   : > { %991 = shalt.err (!%p988_p6)
}
  0x4b   : > { %s1113_s1 = smov 128   ;;  %s1114_s25 = smov 8  }
  0x4c   : > { %858 = dma.hbm_to_vmem [thread:$0]  (!%p1265_p5), %s1451_s0, 256, %s1256_s12, [#allocation3], %s1113_s1, %s1113_s1, %s1114_s25  }
  0x4d   : > { %s992_s14 = scalar_lea.hbm %s1272_s6, 2048  ;;  %p1469_p6 = scmp.ne.s32.totalorder %s1465_s10, 0 }
  0x4e   : > { %p993_p8 = scmp.ne.s32.totalorder %s1272_s6, %s992_s14  ;;  %s997_s27 = scalar_lea.hbm %s1454_s3, 4096 }
  0x4f   : > { %p1470_p13 = pneg %p1469_p6  ;;  %p998_p7 = scmp.lt.u32.totalorder %s1272_s6, %s1454_s3 }
  0x50   : > { %p999_p9 = scmp.lt.u32.totalorder %s997_s27, %s992_s14  ;;  %p1001_p12 = scmp.lt.u32.totalorder %s992_s14, %s1272_s6 }
  0x51   : > { %p995_p2 = pnand %p993_p8, %p1470_p13 }
  0x52   : > { %p1000_p11 = por %p999_p9, %p998_p7 }
  0x53   : > { %p996_p3 = pneg %p995_p2 }
  0x54   : > { %p1002_p10 = por %p1001_p12, %p1000_p11 }
  0x56   : > { %p1003_p0 = pnand %p1002_p10, %p996_p3 }
  0x58   : > { %1006 = shalt.err (!%p1003_p0)
}
  0x59   : > { %s1007_s12 = scalar_lea.vmem %s1274_s8, 2048  ;;  %p1471_p1 = pmov %p1470_p13 }
  0x5a   : > { %p1008_p5 = scmp.ne.s32.totalorder %s1274_s8, %s1007_s12  ;;  %s1115_s26 = smov [#allocation7]  }
  0x5b   : > { %s1012_s7 = sshll.u32 %s1115_s26, 4  ;;  %s1013_s7 = int_to_ptr.vmem [resolvable:$false] %s1012_s7 }
  0x5c   : > { %p1010_p4 = pnand %p1008_p5, %p1471_p1  ;;  %s1014_s11 = scalar_lea.vmem %s1013_s7, 4096 }
  0x5d   : > { %p1015_p13 = scmp.lt.s32.totalorder %s1274_s8, %s1013_s7  ;;  %p1016_p2 = scmp.lt.s32.totalorder %s1014_s11, %s1007_s12 }
  0x5e   : > { %p1011_p8 = pneg %p1010_p4 }
  0x5f   : > { %p1017_p7 = por %p1016_p2, %p1015_p13 }
  0x61   : > { %p1018_p9 = pnand %p1017_p7, %p1011_p8 }
  0x63   : > { %1021 = shalt.err (!%p1018_p9)
}
  0x64   : > { %865 = dma.hbm_to_vmem [thread:$0]  (!%p1469_p6), %s1272_s6, 2048, %s1274_s8, %s1210_s13, %s1113_s1, %s1113_s1, %s1114_s25  }
  0x65   : > { %p1472_p3 = scmp.ne.s32.totalorder %s1467_s17, 0 }
  0x66   : > { %p1473_p11 = scmp.eq.s32.totalorder (!%p1472_p3), %s1239_s15, 0 }
  0x67   : > { %272 = sbr.rel (%p1472_p3) target bundleno = 652 (0x28c), region = 40 }
  0x6e   : > { %1073 = dma.done.wait (%p1473_p11), [#allocation3], 256   ;;  %p1474_p12 = pmov %p1473_p11 }
  0x6f   : > { %s278_s10 = sand.u32 1, %s1239_s15   ;;  %s280_s14 = sand.u32 1, %s1090_s19  }
  0x70   : > { %1075 = vsyncadd (%p1474_p12), [#allocation3], 4294967040  ;;  %s714_s28 = sshll.u32 %s280_s14, 8  ;;  %s279_s9 = scalar_lea.sflag [#allocation6], %s278_s10 }
  0x71   : > { %s1335_s27 = scalar_lea.vmem [#allocation5], %s714_s28  ;;  %p1475_p10 = scmp.ne.s32.totalorder %s1466_s16, 0 }
  0x73   : > { %1077 = dma.done.wait (%p1475_p10), %s279_s9, 6144  }
  0x74   : > { %1079 = vsyncadd (%p1475_p10), %s279_s9, 4294961152  ;;  %s715_s13 = sshll.u32 %s280_s14, 7  ;;  %s716_s17 = sshll.u32 %s1098_s21, 1 }
  0x75   : > { %p325_p6 = scmp.lt.s32.totalorder %s716_s17, 3  ;;  %s1348_s25 = scalar_lea.vmem [#allocation7], %s715_s13 }
  0x76   : > { %p717_p0 = scmp.ne.s32.totalorder %s1098_s21, 0 }
  0x77   : > { %s1484_s17 = smov (!%p325_p6, %s716_s17), 3  ;;  %v1116_v0 = vmov (!%p717_p0), 0.0  }
  0x78   : > { %s327_s1 = scalar_lea.vmem %s1453_s2, %s1484_s17  ;;  %334 = sbr.rel (%p717_p0) target bundleno = 127 (0x7f), region = 56  ;;  %335 = vst [vmem:[#allocation8] sm:$0xff] (!%p717_p0), %v1116_v0  ;;  %336 = vst [vmem:[#allocation8 + $0x8] sm:$0xff] (!%p717_p0), %v1116_v0 }
  0x7f PF: > { %v340_v1 = vld [vmem:[%s1335_s27 + $0x8] sm:$0xff]  ;;  %v342_v2 = vld [vmem:[%s1335_s27 + $0x18] sm:$0xff]  ;;  %v339_v3 = vld [vmem:[%s1335_s27] sm:$0xff]  ;;  %v1117_v8 = vmov 0.0   ;;  %p718_p5 = scmp.ne.s32.totalorder %s1098_s21, 1 }
  0x80   : > { %v779_v4 = vpack.c.bf16 %v342_v2, %v340_v1  ;;  %v341_v5 = vld [vmem:[%s1335_s27 + $0x10] sm:$0xff]  ;;  %v344_v6 = vld [vmem:[%s1335_s27 + $0x28] sm:$0xff]  ;;  %v346_v7 = vld [vmem:[%s1335_s27 + $0x38] sm:$0xff]  ;;  %447 = vmatprep.mubr.f32.mxu0 %v1117_v8 }
  0x81   : > { %v781_v9 = vpack.c.bf16 %v341_v5, %v339_v3  ;;  %v783_v10 = vpack.c.bf16 %v346_v7, %v344_v6  ;;  %v343_v11 = vld [vmem:[%s1335_s27 + $0x20] sm:$0xff]  ;;  %v345_v12 = vld [vmem:[%s1335_s27 + $0x30] sm:$0xff]  ;;  %v348_v13 = vld [vmem:[%s1335_s27 + $0x48] sm:$0xff] }
  0x82   : > { %780 = vmatprep.subr.bf16.mxu0 %v779_v4  ;;  %v350_v14 = vld [vmem:[%s1335_s27 + $0x58] sm:$0xff]  ;;  %v785_v15 = vpack.c.bf16 %v345_v12, %v343_v11  ;;  %v347_v17 = vld [vmem:[%s1335_s27 + $0x40] sm:$0xff]  ;;  %v349_v18 = vld [vmem:[%s1335_s27 + $0x50] sm:$0xff]  ;;  %v373_v12 = vlaneseq }
  0x83   : > { %782 = vmatpush1.bf16.msra.mxu0 %v781_v9  ;;  %v787_v16 = vpack.c.bf16 %v350_v14, %v348_v13  ;;  %v352_v19 = vld [vmem:[%s1335_s27 + $0x68] sm:$0xff]  ;;  %v354_v20 = vld [vmem:[%s1335_s27 + $0x78] sm:$0xff]  ;;  %v789_v21 = vpack.c.bf16 %v349_v18, %v347_v17  ;;  %v351_v23 = vld [vmem:[%s1335_s27 + $0x60] sm:$0xff] }
  0x84   : > { %784 = vmatprep.subr.bf16.mxu0 %v783_v10  ;;  %v791_v22 = vpack.c.bf16 %v354_v20, %v352_v19  ;;  %v353_v24 = vld [vmem:[%s1335_s27 + $0x70] sm:$0xff]  ;;  %v356_v25 = vld [vmem:[%s1335_s27 + $0x88] sm:$0xff]  ;;  %v358_v26 = vld [vmem:[%s1335_s27 + $0x98] sm:$0xff]  ;;  %v374_v13 = vshrl.u32 %v373_v12, 7 }
  0x85   : > { %v474_v27 = vld [vmem:[%s1348_s25] sm:$0xff]  ;;  %v475_v28 = vld [vmem:[%s1348_s25 + $0x8] sm:$0xff]  ;;  %v793_v29 = vpack.c.bf16 %v353_v24, %v351_v23  ;;  %v476_v31 = vld [vmem:[%s1348_s25 + $0x10] sm:$0xff]  ;;  %v795_v33 = vpack.c.bf16 %v358_v26, %v356_v25 }
  0x86   : > { %v811_v30 = vpack.c.bf16 %v475_v28, %v474_v27  ;;  %v477_v32 = vld [vmem:[%s1348_s25 + $0x18] sm:$0xff]  ;;  %v355_v34 = vld [vmem:[%s1335_s27 + $0x80] sm:$0xff]  ;;  %v357_v35 = vld [vmem:[%s1335_s27 + $0x90] sm:$0xff]  ;;  %v379_v14 = vsub.s32 1, %v374_v13  ;;  %v375_v25 = vsub.s32 0, %v374_v13 }
  0x87   : > { %786 = vmatpush1.bf16.msra.mxu0 %v785_v15  ;;  %v815_v36 = vpack.c.bf16 %v477_v32, %v476_v31  ;;  %v360_v37 = vld [vmem:[%s1335_s27 + $0xa8] sm:$0xff]  ;;  %v362_v38 = vld [vmem:[%s1335_s27 + $0xb8] sm:$0xff]  ;;  %v797_v39 = vpack.c.bf16 %v357_v35, %v355_v34  ;;  %v359_v41 = vld [vmem:[%s1335_s27 + $0xa0] sm:$0xff] }
  0x88   : > { %788 = vmatprep.subr.bf16.mxu0 %v787_v16  ;;  %812 = vmatprep.subr.bf16.mxu1 %v811_v30  ;;  %v799_v40 = vpack.c.bf16 %v362_v38, %v360_v37  ;;  %v361_v42 = vld [vmem:[%s1335_s27 + $0xb0] sm:$0xff]  ;;  %v364_v43 = vld [vmem:[%s1335_s27 + $0xc8] sm:$0xff]  ;;  %v366_v44 = vld [vmem:[%s1335_s27 + $0xd8] sm:$0xff] }
  0x89   : > { %814 = vmatpush3.bf16.msra.mxu1 %v811_v30  ;;  %v801_v45 = vpack.c.bf16 %v361_v42, %v359_v41  ;;  %v803_v46 = vpack.c.bf16 %v366_v44, %v364_v43  ;;  %v363_v47 = vld [vmem:[%s1335_s27 + $0xc0] sm:$0xff]  ;;  %v365_v48 = vld [vmem:[%s1335_s27 + $0xd0] sm:$0xff]  ;;  %v368_v49 = vld [vmem:[%s1335_s27 + $0xe8] sm:$0xff] }
  0x8a   : > { %816 = vmatprep.subr.bf16.mxu1 %v815_v36  ;;  %v370_v50 = vld [vmem:[%s1335_s27 + $0xf8] sm:$0xff]  ;;  %v805_v51 = vpack.c.bf16 %v365_v48, %v363_v47  ;;  %v367_v53 = vld [vmem:[%s1335_s27 + $0xe0] sm:$0xff]  ;;  %v369_v54 = vld [vmem:[%s1335_s27 + $0xf0] sm:$0xff] }
  0x8b   : > { %790 = vmatpush1.bf16.msra.mxu0 %v789_v21  ;;  %v807_v52 = vpack.c.bf16 %v370_v50, %v368_v49  ;;  %v809_v55 = vpack.c.bf16 %v369_v54, %v367_v53  ;;  %v337_v56 = vld [vmem:[#allocation2] sm:$0xff]  ;;  %v338_v57 = vld [vmem:[#allocation2 + $0x8] sm:$0xff]  ;;  %v478_v58 = vld [vmem:[%s1348_s25 + $0x20] sm:$0xff] }
  0x8c   : > { %792 = vmatprep.subr.bf16.mxu0 %v791_v22  ;;  %v479_v59 = vld [vmem:[%s1348_s25 + $0x28] sm:$0xff]  ;;  %v480_v61 = vld [vmem:[%s1348_s25 + $0x30] sm:$0xff]  ;;  %v481_v62 = vld [vmem:[%s1348_s25 + $0x38] sm:$0xff] }
  0x8d   : > { %818 = vmatpush3.bf16.msra.mxu1 %v815_v36  ;;  %v819_v60 = vpack.c.bf16 %v479_v59, %v478_v58  ;;  %v823_v63 = vpack.c.bf16 %v481_v62, %v480_v61  ;;  %v482_v0 = vld [vmem:[%s1348_s25 + $0x40] sm:$0xff]  ;;  %v483_v1 = vld [vmem:[%s1348_s25 + $0x48] sm:$0xff]  ;;  %v484_v3 = vld [vmem:[%s1348_s25 + $0x50] sm:$0xff] }
  0x8e   : > { %v827_v2 = vpack.c.bf16 %v483_v1, %v482_v0  ;;  %v485_v4 = vld [vmem:[%s1348_s25 + $0x58] sm:$0xff]  ;;  %v486_v6 = vld [vmem:[%s1348_s25 + $0x60] sm:$0xff]  ;;  %v487_v7 = vld [vmem:[%s1348_s25 + $0x68] sm:$0xff] }
  0x8f   : > { %794 = vmatpush1.bf16.msra.mxu0 %v793_v29  ;;  %820 = vmatprep.subr.bf16.mxu1 %v819_v60  ;;  %v831_v5 = vpack.c.bf16 %v485_v4, %v484_v3  ;;  %v488_v9 = vld [vmem:[%s1348_s25 + $0x70] sm:$0xff]  ;;  %v489_v10 = vld [vmem:[%s1348_s25 + $0x78] sm:$0xff] }
  0x90   : > { %796 = vmatprep.subr.bf16.mxu0 %v795_v33  ;;  %v839_v11 = vpack.c.bf16 %v489_v10, %v488_v9  ;;  %v371_v15 = vld [vmem:[%s327_s1] sm:$0x3] }
  0x91   : > { %822 = vmatpush3.bf16.msra.mxu1 %v819_v60  ;;  %v380_v16 = vrot.slane %v371_v15, %v379_v14  ;;  %v376_v26 = vrot.slane %v371_v15, %v375_v25 }
  0x92   : > { %824 = vmatprep.subr.bf16.mxu1 %v823_v63 }
  0x93   : > { %798 = vmatpush1.bf16.msra.mxu0 %v797_v39  ;;  %v473_v39 = vld [vmem:[#allocation8 + $0x8] sm:$0xff] }
  0x94   : > { %800 = vmatprep.subr.bf16.mxu0 %v799_v40  ;;  %v472_v40 = vld [vmem:[#allocation8] sm:$0xff] }
  0x95   : > { %826 = vmatpush3.bf16.msra.mxu1 %v823_v63 }
  0x96   : > { %828 = vmatprep.subr.bf16.mxu1 %v827_v2 }
  0x97   : > { %802 = vmatpush1.bf16.msra.mxu0 %v801_v45 }
  0x98   : > { %804 = vmatprep.subr.bf16.mxu0 %v803_v46  ;;  %v719_v46 = vld [vmem:[%s1455_s4] ss:$0 sm:$0xff] (!%p718_p5) }
  0x99   : > { %830 = vmatpush3.bf16.msra.mxu1 %v827_v2 }
  0x9a   : > { %832 = vmatprep.subr.bf16.mxu1 %v831_v5 }
  0x9b   : > { %806 = vmatpush1.bf16.msra.mxu0 %v805_v51 }
  0x9c   : > { %808 = vmatprep.subr.bf16.mxu0 %v807_v52 }
  0x9d   : > { %834 = vmatpush3.bf16.msra.mxu1 %v831_v5 }
  0x9f   : > { %810 = vmatpush1.bf16.msra.mxu0 %v809_v55 }
  0xa2   : > { %448 = vmatmul.mubr.f32.vlgmr.msra.gmra.mrb[0].mxu0 %v337_v56 }
  0xa3   : > { %453 = vmatprep.mubr.f32.mxu0 %v1117_v8  ;;  %v835_v8 = vpack.c.bf16 %v487_v7, %v486_v6 }
  0xa5   : > { %836 = vmatprep.subr.bf16.mxu1 %v835_v8 }
  0xa6   : > { %454 = vmatmul.mubr.f32.gmra.mrb[2].mxu0 %v338_v57  ;;  %838 = vmatpush3.bf16.msra.mxu1 %v835_v8 }
  0xa7   : > { %840 = vmatprep.subr.bf16.mxu1 %v839_v11 }
  0xaa   : > { %842 = vmatpush3.bf16.msra.mxu1 %v839_v11 }
 0x175   : > { %v449_v17 = vpop.f32.mrb[0].mxu0 }
 0x176   : > { %v451_v18 = vpop.f32.mrb[1].mxu0  ;;  %v450_v30 = vadd.f32 %v449_v17, %v376_v26 }
 0x177   : > { %v452_v19 = vadd.f32 %v451_v18, %v380_v16 }
 0x179   : > { %v462_v20 = vmul.f32 0.70710677, %v452_v19  ;;  %v455_v21 = vpop.f32.mrb[2].mxu0  ;;  %v460_v28 = vmul.f32 0.5, %v452_v19 }
 0x17a   : > { %v457_v22 = vpop.f32.mrb[3].mxu0  ;;  %v456_v36 = vadd.f32 %v455_v21, %v376_v26 }
 0x17b   : > { %930 = verf.f32 %v462_v20  ;;  %v458_v23 = vadd.f32 %v457_v22, %v380_v16 }
 0x17d   : > { %v463_v24 = vmul.f32 0.70710677, %v458_v23  ;;  %v461_v33 = vmul.f32 0.5, %v458_v23 }
 0x17f   : > { %932 = verf.f32 %v463_v24 }
 0x185   : > { %v931_v27 = vpop.eup %930 }
 0x186   : > { %v466_v29 = vadd.f32 1.0, %v931_v27 }
 0x188   : > { %v468_v31 = vmul.f32 %v466_v29, %v460_v28 }
 0x189   : > { %v933_v32 = vpop.eup %932 }
 0x18a   : > { %v467_v34 = vadd.f32 1.0, %v933_v32  ;;  %v470_v35 = vmul.f32 %v468_v31, %v450_v30 }
 0x18c   : > { %v469_v37 = vmul.f32 %v467_v34, %v461_v33  ;;  %776 = vmatprep.mubr.f32.mxu1 %v470_v35 }
 0x18e   : > { %v471_v38 = vmul.f32 %v469_v37, %v456_v36 }
 0x190   : > { %777 = vmatmul.mubr.f32.vlgmr.msra.gmra.mrb[0].mxu1 %v471_v38 }
 0x261   : > { %572 = sbr.rel (%p718_p5) target bundleno = 626 (0x272), region = 60 }
 0x263   : > { %v778_v41 = vpop.f32.mrb[0].mxu1 }
 0x264   : > { %v566_v42 = vadd.f32 %v778_v41, %v473_v39  ;;  %v556_v43 = vpop.f32.mrb[1].mxu1 }
 0x265   : > { %v565_v44 = vadd.f32 %v556_v43, %v472_v40 }
 0x266   : > { %568 = vst [vmem:[#allocation8 + $0x8] sm:$0xff] %v566_v42 }
 0x267   : > { %567 = vst [vmem:[#allocation8] sm:$0xff] %v565_v44 }
 0x26d   : > { %v574_v47 = vld [vmem:[#allocation8 + $0x8] sm:$0xff] }
 0x26e   : > { %v573_v45 = vld [vmem:[#allocation8] sm:$0xff]  ;;  %v583_v49 = vadd.f32 %v719_v46, %v574_v47 }
 0x26f   : > { %v582_v48 = vadd.f32 %v719_v46, %v573_v45 }
 0x270   : > { %585 = vst [vmem:[#allocation8 + $0x8] sm:$0xff] %v583_v49 }
 0x271   : > { %584 = vst [vmem:[#allocation8] sm:$0xff] %v582_v48 }
 0x272 PF: > { %p869_p1 = scmp.eq.s32.totalorder %s1239_s15, 1  ;;  %s1118_s26 = smov [#allocation8]  }
 0x273   : > { %s595_s7 = sshll.u32 %s1118_s26, 4  ;;  %s596_s7 = int_to_ptr.vmem [resolvable:$true] %s595_s7 }
 0x274   : > { %s1022_s11 = scalar_lea.vmem %s596_s7, 256  ;;  %p1029_p2 = scmp.lt.s32.totalorder %s596_s7, %s596_s7 }
 0x275   : > { %p1023_p4 = scmp.ne.s32.totalorder %s596_s7, %s1022_s11  ;;  %p1030_p7 = scmp.lt.s32.totalorder %s1022_s11, %s1022_s11 }
 0x277   : > { %p1024_p8 = pnand %p1023_p4, %p869_p1  ;;  %p1031_p9 = por %p1030_p7, %p1029_p2 }
 0x279   : > { %p1025_p13 = pneg %p1024_p8 }
 0x27b   : > { %p1032_p3 = pnand %p1031_p9, %p1025_p13 }
 0x27d   : > { %1035 = shalt.err (!%p1032_p3)
}
 0x27e   : > { %s1036_s14 = scalar_lea.hbm %s1456_s5, 256 }
 0x27f   : > { %p1037_p11 = scmp.ne.s32.totalorder %s1456_s5, %s1036_s14  ;;  %p1042_p6 = scmp.lt.u32.totalorder %s1036_s14, %s1456_s5 }
 0x281   : > { %p1038_p12 = pnand %p1037_p11, %p869_p1 }
 0x283   : > { %p1039_p10 = pneg %p1038_p12 }
 0x285   : > { %p1044_p0 = pnand %p1042_p6, %p1039_p10 }
 0x287   : > { %1047 = shalt.err (!%p1044_p0)
}
 0x288   : > { %s1119_s17 = smov 128   ;;  %s1120_s6 = smov 8  }
 0x289   : > { %852 = dma.vmem_to_hbm [thread:$0]  (%p869_p1), %s596_s7, 256, %s1456_s5, [#allocation4], %s1119_s17, %s1119_s17, %s1120_s6  }
 0x28a   : > { %1081 = dma.done.wait (%p869_p1), [#allocation4], 256  }
 0x28b   : > { %1083 = vsyncadd (%p869_p1), [#allocation4], 4294967040 }
 0x28c PF: > { %s20_s23 = sadd.s32 1, %s1106_s23   ;;  %s1476_s18 = smov %s1090_s19 }
 0x28d   : > { %p17_p5 = scmp.ge.s32.totalorder %s20_s23, 4   ;;  %s1477_s19 = smov %s1094_s20 }
 0x28e   : > { %s1478_s20 = smov %s1195_s30  ;;  %s1479_s21 = smov %s1102_s22 }
 0x28f   : > { %s1480_s22 = smov %s1482_s24  ;;  %19 = sbr.rel (!%p17_p5) target bundleno = 8 (0x8), region = 106 }
 0x296   :  { %611 = vsyncpa [#allocation3], 1 }
 0x297   :  { %613 = vsyncpa [#allocation3 + $0x1], 1 }
 0x298   :  { %614 = vsyncpa [#allocation6], 1 }
 0x299   :  { %616 = vsyncpa [#allocation6 + $0x1], 1 }
 0x29a   :  { %617 = vsyncpa [#allocation4], 1 }
 0x29b   :  { %619 = vsyncpa [#allocation4 + $0x1], 1 }

</bundles_post_ra>
